<compile_context>
chip_gen: v7x
topology: tpu7x:2x2x1
jax: 0.10.0
libtpu: 0.0.40
codegen_flags: <defaults>
</compile_context>

<pallas_src>
import functools

import jax
import jax.numpy as jnp
from jax.experimental import pallas as pl
from jax.experimental.pallas import tpu as pltpu


# ----------------------------------------------------------------------------
# Hardware queries (all guarded; fall back to conservative values).
# ----------------------------------------------------------------------------
def _device_kind():
    try:
        return jax.devices()[0].device_kind.lower()
    except Exception:
        return ""


def _vmem_capacity_bytes():
    try:
        return int(pltpu.get_tpu_info().vmem_capacity_bytes)
    except Exception:
        return 64 << 20            # conservative: v7x per-TensorCore VMEM


def _num_tensorcores():
    kind = _device_kind()
    # Chips with 2 TensorCores per device: shard the vocab stream across them.
    if "v7" in kind or "v4" in kind or "v5p" in kind:
        return 2
    return 1                        # v5e / v6e / unknown -> single core (always correct)


def _round_up(x, m):
    return -(-x // m) * m


def _pick_tv(V, H, mxu_itemsize, tv_max=None):
    """Vocab tile width: generation-aware, VMEM-budget capped, multiple of 128."""
    if tv_max is None:
        kind = _device_kind()
        if "v7" in kind:
            tv_max = 4096
        elif "v6" in kind:
            tv_max = 2048
        else:                       # v5e / unknown
            tv_max = 1024
    budget = _vmem_capacity_bytes() // 4                   # double-buffered w_fc stream
    tv_fit = max(128, (budget // max(1, 2 * H * mxu_itemsize)) // 128 * 128)
    tv = min(tv_max, tv_fit)
    return V if V <= tv else tv


# ----------------------------------------------------------------------------
# Kernel
# ----------------------------------------------------------------------------
def _decoder_lstm_kernel(xh_ref, c_ref, w_xh_ref, b_ref, b_fc_ref, w_fc_ref,
                         pred_ref, h_out_ref, c_out_ref, h_sc):
    """Grid: (NC, T // NC).  axis 0 = TensorCore ("parallel"), axis 1 = vocab tile.

    Resident (single-copy VMEM) inputs:
      xh_ref   : (B, E+H)    [embedded token | previous hidden], MXU dtype
      c_ref    : (B, H)      previous cell state (f32)
      w_xh_ref : (E+H, 4*Hg) stacked [W_ih^T ; W_hh^T], gate-stride Hg = roundup(H,128)
      b_ref    : (1, 4*Hg)   b_ih + b_hh (f32)
      b_fc_ref : (T, 1, TV)  full fc_out bias, tile-major (f32)
    Streamed input:
      w_fc_ref : (1, H, TV)  contiguous fc_out weight tile (MXU dtype)
    Outputs:
      pred_ref : (B, TV)     logits tile (f32)
      h_out_ref: (1, B, H)   this core's new hidden slab (f32)
      c_out_ref: (1, B, H)   this core's new cell slab (f32)
    Scratch:
      h_sc     : (B, H)      new hidden in MXU dtype, reused by every vocab tile
    """
    j = pl.program_id(1)

    @pl.when(j == 0)
    def _lstm_cell():
        # One fused MXU matmul for all four gates (f32 accumulation).
        gates = (jnp.dot(xh_ref[...], w_xh_ref[...],
                         preferred_element_type=jnp.float32) + b_ref[...])
        n_h = c_ref.shape[-1]
        hg = gates.shape[-1] // 4               # lane-aligned per-gate stride
        i_g = jax.nn.sigmoid(gates[:, 0 * hg:0 * hg + n_h])
        f_g = jax.nn.sigmoid(gates[:, 1 * hg:1 * hg + n_h])
        g_g = jnp.tanh(gates[:, 2 * hg:2 * hg + n_h])
        o_g = jax.nn.sigmoid(gates[:, 3 * hg:3 * hg + n_h])

        c_new = f_g * c_ref[...] + i_g * g_g    # f32 cell update (VPU/EUP)
        h_new = o_g * jnp.tanh(c_new)

        h_sc[...] = h_new.astype(h_sc.dtype)    # MXU-dtype copy for the fc matmuls
        h_out_ref[0] = h_new.astype(h_out_ref.dtype)
        c_out_ref[0] = c_new.astype(c_out_ref.dtype)

    # Per-tile vocab projection: pred_tile = h_new @ W_fc_tile + b_fc_tile.
    vt = pl.program_id(0) * pl.num_programs(1) + j          # global vocab tile index
    pred = jnp.dot(h_sc[...], w_fc_ref[0], preferred_element_type=jnp.float32)
    pred = pred + b_fc_ref[vt]                               # resident bias, dynamic row
    pred_ref[...] = pred.astype(pred_ref.dtype)


# ----------------------------------------------------------------------------
# One-time parameter repacking (PyTorch layout -> kernel layout)
# ----------------------------------------------------------------------------
def convert_params(params, compute_dtype=jnp.float32, tv_max=None, num_cores=None):
    """compute_dtype is the MXU-operand dtype (bf16 recommended on v6e/v7x; keep
    f32 on v5e unless the fc matmul is MXU-bound).  Biases / recurrent state stay f32."""
    w_ih = params["w_ih"]                                    # (4H, E)
    w_hh = params["w_hh"]                                    # (4H, H)
    H = w_hh.shape[1]
    E = w_ih.shape[1]
    hg = _round_up(H, 128)                                   # lane-aligned gate stride

    w_xh = jnp.concatenate([w_ih.T, w_hh.T], axis=0)         # (E+H, 4H)
    b = (params["b_ih"] + params["b_hh"])[None, :]           # (1, 4H)
    if hg != H:                                              # pad each gate block to hg
        w_xh = jnp.pad(w_xh.reshape(E + H, 4, H),
                       ((0, 0), (0, 0), (0, hg - H))).reshape(E + H, 4 * hg)
        b = jnp.pad(b.reshape(1, 4, H),
                    ((0, 0), (0, 0), (0, hg - H))).reshape(1, 4 * hg)
    w_xh = w_xh.astype(compute_dtype)
    b = b.astype(jnp.float32)

    w_fc = params["w_fc"].T.astype(compute_dtype)            # (H, V)
    b_fc = params["b_fc"].astype(jnp.float32)                # (V,)
    V = w_fc.shape[1]

    itemsize = jnp.dtype(compute_dtype).itemsize
    tv = _pick_tv(V, H, itemsize, tv_max=tv_max)
    nc = _num_tensorcores() if num_cores is None else num_cores
    num_tiles = -(-V // tv)
    nc = max(1, min(nc, num_tiles))
    num_tiles = _round_up(num_tiles, nc)                     # even split across cores
    v_pad = num_tiles * tv
    if v_pad != V:                                           # pad vocab ONCE, not per call
        w_fc = jnp.pad(w_fc, ((0, 0), (0, v_pad - V)))
        b_fc = jnp.pad(b_fc, ((0, v_pad - V),))

    # Tile-major repack: each streamed (H, TV) tile is one contiguous HBM slab.
    w_fc = w_fc.reshape(H, num_tiles, tv).transpose(1, 0, 2)  # (T, H, TV)
    b_fc = b_fc.reshape(num_tiles, 1, tv)                     # (T, 1, TV), VMEM-resident

    emb = params["embedding"].astype(compute_dtype)           # (V, E)
    return {"embedding": emb, "w_xh": w_xh, "b": b, "w_fc": w_fc, "b_fc": b_fc,
            "vocab": V, "tv": tv, "num_tiles": num_tiles, "nc": nc}


def _vmem_limit_bytes(B, EH, H, HG4, T, TV, mxu_dtype):
    isz = jnp.dtype(mxu_dtype).itemsize
    f32 = 4
    resident = (B * EH * isz + B * H * f32 + EH * HG4 * isz + HG4 * f32
                + T * 8 * TV * f32)                 # b_fc rows pad to 8 sublanes
    streamed = 2 * H * TV * isz                     # double-buffered w_fc tile
    outs = 2 * B * TV * f32 + 4 * B * H * f32       # pred tiles + h/c slabs
    scratch = B * H * isz
    need = resident + streamed + outs + scratch + (2 << 20)
    cap = _vmem_capacity_bytes()                    # clamp to REAL chip VMEM (v7x: 64 MiB)
    return int(min(max(need, 32 << 20), cap - (2 << 20)))


# ----------------------------------------------------------------------------
# Forward wrapper (mirrors DecoderLSTM.forward for one decode step)
# ----------------------------------------------------------------------------
def decoder_lstm_forward(tokens, hidden, cell, kparams):
    """tokens : (B,) int32 token ids (the PyTorch `input` before unsqueeze)
    hidden : (1, B, H)  previous hidden state
    cell   : (1, B, H)  previous cell state
    returns (prediction (B, V), hidden (1, B, H), cell (1, B, H))"""
    emb, w_xh, b = kparams["embedding"], kparams["w_xh"], kparams["b"]
    w_fc, b_fc = kparams["w_fc"], kparams["b_fc"]
    V, TV, T, NC = kparams["vocab"], kparams["tv"], kparams["num_tiles"], kparams["nc"]

    B = tokens.shape[0]
    H = hidden.shape[-1]
    EH = w_xh.shape[0]
    HG4 = w_xh.shape[1]
    mxu_dtype = w_xh.dtype
    TPC = T // NC                                   # vocab tiles per TensorCore
    v_pad = T * TV

    # TODO(synk): for a multi-token greedy decode loop, hoist the timestep loop in-kernel
    # (w_fc resident in VMEM on v5e/v6e, halves split across v7x's 2 TCs) and pull the
    # embedding gather inside via PrefetchScalarGridSpec + pl.Element row blocks.
    # TODO(synk): batching decode streams so B >= 64-256 is the biggest remaining lever
    # (amortizes the whole w_fc HBM stream; at small B this kernel is HBM-bound).
    x_emb = jnp.take(emb, tokens, axis=0)                                  # (B, E)
    xh = jnp.concatenate([x_emb, hidden[0].astype(mxu_dtype)], axis=-1)    # (B, E+H)
    c0 = cell[0].astype(jnp.float32)                                       # (B, H)

    def _resident():
        # Whole array copied to VMEM once: no blocking, no double-buffering.
        return pl.BlockSpec(memory_space=pltpu.MemorySpace.VMEM)

    pred, h_new, c_new = pl.pallas_call(
        _decoder_lstm_kernel,
        grid=(NC, TPC),
        in_specs=[
            _resident(),                                              # xh
            _resident(),                                              # c0
            _resident(),                                              # w_xh
            _resident(),                                              # gate bias
            _resident(),                                              # b_fc (full, resident)
            pl.BlockSpec((1, H, TV), lambda i, j: (i * TPC + j, 0, 0)),  # w_fc tile stream
        ],
        out_specs=(
            pl.BlockSpec((B, TV), lambda i, j: (0, i * TPC + j)),     # logits tile
            pl.BlockSpec((1, B, H), lambda i, j: (i, 0, 0)),          # per-core h slab
            pl.BlockSpec((1, B, H), lambda i, j: (i, 0, 0)),          # per-core c slab
        ),
        out_shape=(
            jax.ShapeDtypeStruct((B, v_pad), jnp.float32),
            jax.ShapeDtypeStruct((NC, B, H), jnp.float32),
            jax.ShapeDtypeStruct((NC, B, H), jnp.float32),
        ),
        scratch_shapes=[pltpu.VMEM((B, H), mxu_dtype)],
        compiler_params=pltpu.CompilerParams(
            dimension_semantics=("parallel", "arbitrary"),            # cores x vocab tiles
            vmem_limit_bytes=_vmem_limit_bytes(B, EH, H, HG4, T, TV, mxu_dtype)),
    )(xh, c0, w_xh, b, b_fc, w_fc)

    if v_pad != V:
        pred = pred[:, :V]
    return pred, h_new[0][None], c_new[0][None]


# ----------------------------------------------------------------------------
# PyTorch-layout param init + pure-JAX reference (for validation)
# ----------------------------------------------------------------------------
def init_params(key, output_dim, emb_dim, hidden_dim):
    ks = jax.random.split(key, 7)
    s = 1.0 / jnp.sqrt(hidden_dim)
    return {
        "embedding": jax.random.normal(ks[0], (output_dim, emb_dim), jnp.float32),
        "w_ih": jax.random.uniform(ks[1], (4 * hidden_dim, emb_dim), jnp.float32, -s, s),
        "w_hh": jax.random.uniform(ks[2], (4 * hidden_dim, hidden_dim), jnp.float32, -s, s),
        "b_ih": jax.random.uniform(ks[3], (4 * hidden_dim,), jnp.float32, -s, s),
        "b_hh": jax.random.uniform(ks[4], (4 * hidden_dim,), jnp.float32, -s, s),
        "w_fc": jax.random.uniform(ks[5], (output_dim, hidden_dim), jnp.float32, -s, s),
        "b_fc": jax.random.uniform(ks[6], (output_dim,), jnp.float32, -s, s),
    }


def _reference_forward(tokens, hidden, cell, params):
    x = jnp.take(params["embedding"], tokens, axis=0)
    h, c = hidden[0], cell[0]
    gates = x @ params["w_ih"].T + h @ params["w_hh"].T + params["b_ih"] + params["b_hh"]
    H = h.shape[-1]
    i = jax.nn.sigmoid(gates[:, :H])
    f = jax.nn.sigmoid(gates[:, H:2 * H])
    g = jnp.tanh(gates[:, 2 * H:3 * H])
    o = jax.nn.sigmoid(gates[:, 3 * H:4 * H])
    c_new = f * c + i * g
    h_new = o * jnp.tanh(c_new)
    pred = h_new @ params["w_fc"].T + params["b_fc"]
    return pred, h_new[None], c_new[None]


if __name__ == "__main__":
    # Small shapes: batch=8, vocab(output_dim)=64, emb_dim=32, hidden_dim=32, n_layers=1.
    B, V, E, H = 8, 64, 32, 32

    key = jax.random.PRNGKey(0)
    k_p, k_tok, k_h, k_c = jax.random.split(key, 4)

    params = init_params(k_p, output_dim=V, emb_dim=E, hidden_dim=H)
    tokens = jax.random.randint(k_tok, (B,), 0, V, dtype=jnp.int32)
    hidden = jax.random.normal(k_h, (1, B, H), jnp.float32)
    cell = jax.random.normal(k_c, (1, B, H), jnp.float32)

    pred_r, h_r, c_r = _reference_forward(tokens, hidden, cell, params)

    # --- f32 MXU operands: tight tolerance vs the PyTorch-semantics reference.
    kp_f32 = convert_params(params, compute_dtype=jnp.float32)
    fwd_f32 = jax.jit(functools.partial(decoder_lstm_forward, kparams=kp_f32))
    pred, h_new, c_new = fwd_f32(tokens, hidden, cell)
    jax.block_until_ready((pred, h_new, c_new))
    assert pred.shape == (B, V) and h_new.shape == (1, B, H) and c_new.shape == (1, B, H)
    assert jnp.allclose(pred, pred_r, atol=1e-4, rtol=1e-4)
    assert jnp.allclose(h_new, h_r, atol=1e-4, rtol=1e-4)
    assert jnp.allclose(c_new, c_r, atol=1e-4, rtol=1e-4)

    # --- bf16 MXU operands (v6e/v7x-native weights); activations/state stay f32.
    kp_bf16 = convert_params(params, compute_dtype=jnp.bfloat16)
    fwd_bf16 = jax.jit(functools.partial(decoder_lstm_forward, kparams=kp_bf16))
    pred_b, h_b, c_b = fwd_bf16(tokens, hidden, cell)
    jax.block_until_ready((pred_b, h_b, c_b))
    assert jnp.allclose(pred_b, pred_r, atol=5e-2, rtol=5e-2)
    assert jnp.allclose(h_b, h_r, atol=5e-2, rtol=5e-2)
    assert jnp.allclose(c_b, c_r, atol=5e-2, rtol=5e-2)

    print("KERNEL_OK")
</pallas_src>

<mosaic_0001>
module attributes {stable_mosaic.version = 11 : i64} {
  func.func @_decoder_lstm_kernel(%arg0: i32, %arg1: i32, %arg2: memref<8x64xf32, #tpu.memory_space<vmem>>, %arg3: memref<8x32xf32, #tpu.memory_space<vmem>>, %arg4: memref<64x512xf32, #tpu.memory_space<vmem>>, %arg5: memref<1x512xf32, #tpu.memory_space<vmem>>, %arg6: memref<1x1x64xf32, #tpu.memory_space<vmem>>, %arg7: memref<1x32x64xf32, #tpu.memory_space<vmem>>, %arg8: memref<8x64xf32, #tpu.memory_space<vmem>>, %arg9: memref<1x8x32xf32, #tpu.memory_space<vmem>>, %arg10: memref<1x8x32xf32, #tpu.memory_space<vmem>>, %arg11: memref<8x32xf32, #tpu.memory_space<vmem>>) attributes {dimension_semantics = [#tpu.dimension_semantics<parallel>, #tpu.dimension_semantics<arbitrary>], iteration_bounds = array<i64: 1, 1>, scalar_prefetch = 0 : i64, scratch_operands = 1 : i64, tpu.core_type = #tpu.core_type<tc>, window_params = [{pipeline_mode = #tpu.pipeline_mode<synchronous>, transform_indices = @transform_0, window_bounds = array<i64: 8, 64>}, {pipeline_mode = #tpu.pipeline_mode<synchronous>, transform_indices = @transform_1, window_bounds = array<i64: 8, 32>}, {pipeline_mode = #tpu.pipeline_mode<synchronous>, transform_indices = @transform_2, window_bounds = array<i64: 64, 512>}, {pipeline_mode = #tpu.pipeline_mode<synchronous>, transform_indices = @transform_3, window_bounds = array<i64: 1, 512>}, {pipeline_mode = #tpu.pipeline_mode<synchronous>, transform_indices = @transform_4, window_bounds = array<i64: 1, 1, 64>}, {transform_indices = @transform_5, window_bounds = array<i64: 1, 32, 64>}, {transform_indices = @transform_6, window_bounds = array<i64: 8, 64>}, {transform_indices = @transform_7, window_bounds = array<i64: 1, 8, 32>}, {transform_indices = @transform_8, window_bounds = array<i64: 1, 8, 32>}]} {
    %c0_i32 = arith.constant 0 : i32
    %0 = arith.cmpi eq, %arg1, %c0_i32 : i32
    %1 = arith.extui %0 : i1 to i32
    %c0_i32_0 = arith.constant 0 : i32
    %2 = arith.cmpi ne, %1, %c0_i32_0 : i32
    scf.if %2 {
      %c0_9 = arith.constant 0 : index
      %c0_10 = arith.constant 0 : index
      %15 = vector.load %arg2[%c0_9, %c0_10] : memref<8x64xf32, #tpu.memory_space<vmem>>, vector<8x64xf32>
      %c0_11 = arith.constant 0 : index
      %c0_12 = arith.constant 0 : index
      %16 = vector.load %arg4[%c0_11, %c0_12] : memref<64x512xf32, #tpu.memory_space<vmem>>, vector<64x512xf32>
      %cst_13 = arith.constant dense<0.000000e+00> : vector<8x512xf32>
      %17 = tpu.matmul %15, %16, %cst_13 {dimension_numbers = #tpu.dot_dimension_numbers<[1], [0], [0], [1], [0, 0, 1, 1], [], []>} : vector<8x64xf32>, vector<64x512xf32>, vector<8x512xf32> -> vector<8x512xf32>
      %c0_14 = arith.constant 0 : index
      %c0_15 = arith.constant 0 : index
      %18 = vector.load %arg5[%c0_14, %c0_15] : memref<1x512xf32, #tpu.memory_space<vmem>>, vector<1x512xf32>
      %19 = vector.broadcast %18 : vector<1x512xf32> to vector<8x512xf32>
      %20 = arith.addf %17, %19 : vector<8x512xf32>
      %21 = vector.extract_strided_slice %20 {offsets = [0, 0], sizes = [8, 32], strides = [1, 1]} : vector<8x512xf32> to vector<8x32xf32>
      %22 = arith.negf %21 : vector<8x32xf32>
      %23 = math.exp %22 : vector<8x32xf32>
      %cst_16 = arith.constant 1.000000e+00 : f32
      %24 = vector.broadcast %cst_16 : f32 to vector<8x32xf32>
      %25 = arith.addf %24, %23 : vector<8x32xf32>
      %26 = arith.divf %24, %25 : vector<8x32xf32>
      %27 = vector.extract_strided_slice %20 {offsets = [0, 128], sizes = [8, 32], strides = [1, 1]} : vector<8x512xf32> to vector<8x32xf32>
      %28 = arith.negf %27 : vector<8x32xf32>
      %29 = math.exp %28 : vector<8x32xf32>
      %cst_17 = arith.constant 1.000000e+00 : f32
      %30 = vector.broadcast %cst_17 : f32 to vector<8x32xf32>
      %31 = arith.addf %30, %29 : vector<8x32xf32>
      %32 = arith.divf %30, %31 : vector<8x32xf32>
      %33 = vector.extract_strided_slice %20 {offsets = [0, 256], sizes = [8, 32], strides = [1, 1]} : vector<8x512xf32> to vector<8x32xf32>
      %34 = math.tanh %33 : vector<8x32xf32>
      %35 = vector.extract_strided_slice %20 {offsets = [0, 384], sizes = [8, 32], strides = [1, 1]} : vector<8x512xf32> to vector<8x32xf32>
      %36 = arith.negf %35 : vector<8x32xf32>
      %37 = math.exp %36 : vector<8x32xf32>
      %cst_18 = arith.constant 1.000000e+00 : f32
      %38 = vector.broadcast %cst_18 : f32 to vector<8x32xf32>
      %39 = arith.addf %38, %37 : vector<8x32xf32>
      %40 = arith.divf %38, %39 : vector<8x32xf32>
      %c0_19 = arith.constant 0 : index
      %c0_20 = arith.constant 0 : index
      %41 = vector.load %arg3[%c0_19, %c0_20] : memref<8x32xf32, #tpu.memory_space<vmem>>, vector<8x32xf32>
      %42 = arith.mulf %32, %41 : vector<8x32xf32>
      %43 = arith.mulf %26, %34 : vector<8x32xf32>
      %44 = arith.addf %42, %43 : vector<8x32xf32>
      %45 = math.tanh %44 : vector<8x32xf32>
      %46 = arith.mulf %40, %45 : vector<8x32xf32>
      %c0_21 = arith.constant 0 : index
      %c0_22 = arith.constant 0 : index
      %47 = vector.load %arg11[%c0_21, %c0_22] : memref<8x32xf32, #tpu.memory_space<vmem>>, vector<8x32xf32>
      tpu.vector_store %arg11[%c0_21, %c0_22], %46 {strides = array<i32>} : memref<8x32xf32, #tpu.memory_space<vmem>>, vector<8x32xf32>,
      %c0_23 = arith.constant 0 : index
      %c0_24 = arith.constant 0 : index
      %c0_25 = arith.constant 0 : index
      %48 = vector.load %arg9[%c0_23, %c0_24, %c0_25] : memref<1x8x32xf32, #tpu.memory_space<vmem>>, vector<1x8x32xf32>
      %49 = vector.shape_cast %48 : vector<1x8x32xf32> to vector<8x32xf32>
      %50 = vector.shape_cast %46 : vector<8x32xf32> to vector<1x8x32xf32>
      tpu.vector_store %arg9[%c0_23, %c0_24, %c0_25], %50 {strides = array<i32>} : memref<1x8x32xf32, #tpu.memory_space<vmem>>, vector<1x8x32xf32>,
      %c0_26 = arith.constant 0 : index
      %c0_27 = arith.constant 0 : index
      %c0_28 = arith.constant 0 : index
      %51 = vector.load %arg10[%c0_26, %c0_27, %c0_28] : memref<1x8x32xf32, #tpu.memory_space<vmem>>, vector<1x8x32xf32>
      %52 = vector.shape_cast %51 : vector<1x8x32xf32> to vector<8x32xf32>
      %53 = vector.shape_cast %44 : vector<8x32xf32> to vector<1x8x32xf32>
      tpu.vector_store %arg10[%c0_26, %c0_27, %c0_28], %53 {strides = array<i32>} : memref<1x8x32xf32, #tpu.memory_space<vmem>>, vector<1x8x32xf32>,
    } else {
    }
    %c1_i32 = arith.constant 1 : i32
    %3 = arith.muli %arg0, %c1_i32 : i32
    %4 = arith.addi %3, %arg1 : i32
    %c0 = arith.constant 0 : index
    %c0_1 = arith.constant 0 : index
    %5 = vector.load %arg11[%c0, %c0_1] : memref<8x32xf32, #tpu.memory_space<vmem>>, vector<8x32xf32>
    %c0_2 = arith.constant 0 : index
    %c0_3 = arith.constant 0 : index
    %c0_4 = arith.constant 0 : index
    %6 = vector.load %arg7[%c0_2, %c0_3, %c0_4] : memref<1x32x64xf32, #tpu.memory_space<vmem>>, vector<1x32x64xf32>
    %7 = vector.shape_cast %6 : vector<1x32x64xf32> to vector<32x64xf32>
    %cst = arith.constant dense<0.000000e+00> : vector<8x64xf32>
    %8 = tpu.matmul %5, %7, %cst {dimension_numbers = #tpu.dot_dimension_numbers<[1], [0], [0], [1], [0, 0, 1, 1], [], []>} : vector<8x32xf32>, vector<32x64xf32>, vector<8x64xf32> -> vector<8x64xf32>
    %9 = arith.index_cast %4 : i32 to index
    %c0_5 = arith.constant 0 : index
    %c0_6 = arith.constant 0 : index
    %10 = vector.load %arg6[%9, %c0_5, %c0_6] : memref<1x1x64xf32, #tpu.memory_space<vmem>>, vector<1x1x64xf32>
    %11 = vector.shape_cast %10 : vector<1x1x64xf32> to vector<1x64xf32>
    %12 = vector.broadcast %11 : vector<1x64xf32> to vector<8x64xf32>
    %13 = arith.addf %8, %12 : vector<8x64xf32>
    %c0_7 = arith.constant 0 : index
    %c0_8 = arith.constant 0 : index
    %14 = vector.load %arg8[%c0_7, %c0_8] : memref<8x64xf32, #tpu.memory_space<vmem>>, vector<8x64xf32>
    tpu.vector_store %arg8[%c0_7, %c0_8], %13 {strides = array<i32>} : memref<8x64xf32, #tpu.memory_space<vmem>>, vector<8x64xf32>,
    return
  }
  func.func @transform_0(%arg0: i32, %arg1: i32) -> (i32, i32) {
    %c0_i32 = arith.constant 0 : i32
    %c0_i32_0 = arith.constant 0 : i32
    %c0_i32_1 = arith.constant 0 : i32
    return %c0_i32, %c0_i32_0 : i32, i32
  }
  func.func @transform_1(%arg0: i32, %arg1: i32) -> (i32, i32) {
    %c0_i32 = arith.constant 0 : i32
    %c0_i32_0 = arith.constant 0 : i32
    %c0_i32_1 = arith.constant 0 : i32
    return %c0_i32, %c0_i32_0 : i32, i32
  }
  func.func @transform_2(%arg0: i32, %arg1: i32) -> (i32, i32) {
    %c0_i32 = arith.constant 0 : i32
    %c0_i32_0 = arith.constant 0 : i32
    %c0_i32_1 = arith.constant 0 : i32
    return %c0_i32, %c0_i32_0 : i32, i32
  }
  func.func @transform_3(%arg0: i32, %arg1: i32) -> (i32, i32) {
    %c0_i32 = arith.constant 0 : i32
    %c0_i32_0 = arith.constant 0 : i32
    %c0_i32_1 = arith.constant 0 : i32
    return %c0_i32, %c0_i32_0 : i32, i32
  }
  func.func @transform_4(%arg0: i32, %arg1: i32) -> (i32, i32, i32) {
    %c0_i32 = arith.constant 0 : i32
    %c0_i32_0 = arith.constant 0 : i32
    %c0_i32_1 = arith.constant 0 : i32
    %c0_i32_2 = arith.constant 0 : i32
    return %c0_i32, %c0_i32_0, %c0_i32_1 : i32, i32, i32
  }
  func.func @transform_5(%arg0: i32, %arg1: i32) -> (i32, i32, i32) {
    %c1_i32 = arith.constant 1 : i32
    %0 = arith.muli %arg0, %c1_i32 : i32
    %1 = arith.addi %0, %arg1 : i32
    %c0_i32 = arith.constant 0 : i32
    %c0_i32_0 = arith.constant 0 : i32
    %c0_i32_1 = arith.constant 0 : i32
    return %1, %c0_i32, %c0_i32_0 : i32, i32, i32
  }
  func.func @transform_6(%arg0: i32, %arg1: i32) -> (i32, i32) {
    %c1_i32 = arith.constant 1 : i32
    %0 = arith.muli %arg0, %c1_i32 : i32
    %1 = arith.addi %0, %arg1 : i32
    %c0_i32 = arith.constant 0 : i32
    %c0_i32_0 = arith.constant 0 : i32
    return %c0_i32, %1 : i32, i32
  }
  func.func @transform_7(%arg0: i32, %arg1: i32) -> (i32, i32, i32) {
    %c0_i32 = arith.constant 0 : i32
    %c0_i32_0 = arith.constant 0 : i32
    %c0_i32_1 = arith.constant 0 : i32
    return %arg0, %c0_i32, %c0_i32_0 : i32, i32, i32
  }
  func.func @transform_8(%arg0: i32, %arg1: i32) -> (i32, i32, i32) {
    %c0_i32 = arith.constant 0 : i32
    %c0_i32_0 = arith.constant 0 : i32
    %c0_i32_1 = arith.constant 0 : i32
    return %arg0, %c0_i32, %c0_i32_0 : i32, i32, i32
  }
}

</mosaic_0001>

<bundles_post_ra>
// kernel: decoder_lstm_forward.1
= control target key start
LH: loop header
LB: loop body
LE: loop exit
PB: predicated region body
PF: predicated region fallthrough
CT: control target
= control target key end

     0   :  { %14 = vsyncpa [#allocation4], 0  ;;  %s750_s0 = inlined_call_operand.vmem [shape: f32[8,64], index: 0, kind: input, shape index: {}]   ;;  %s751_s1 = inlined_call_operand.vmem [shape: f32[8,32], index: 1, kind: input, shape index: {}]   ;;  %s752_s2 = inlined_call_operand.hbm [shape: f32[64,512], index: 2, kind: input, shape index: {}]   ;;  %s753_s3 = inlined_call_operand.vmem [shape: f32[1,512], index: 3, kind: input, shape index: {}]   ;;  %s754_s4 = inlined_call_operand.vmem [shape: f32[1,1,64], index: 4, kind: input, shape index: {}]   ;;  %s755_s5 = inlined_call_operand.vmem [shape: f32[1,32,64], index: 5, kind: input, shape index: {}]   ;;  %s756_s6 = inlined_call_operand.hbm [shape: f32[8,64], index: 6, kind: output, shape index: {0}]   ;;  %s757_s7 = inlined_call_operand.hbm [shape: f32[1,8,32], index: 7, kind: output, shape index: {1}]   ;;  %s758_s8 = inlined_call_operand.hbm [shape: f32[1,8,32], index: 8, kind: output, shape index: {2}]  }
   0x1   :  { %15 = vsyncpa [#allocation5], 0 }
   0x2   :  { %16 = vsyncpa [#allocation8], 0  ;;  %s618_s27 = smov [#allocation3]   ;;  %s524_s9 = scalar_lea.hbm %s752_s2, 4096 }
   0x3   :  { %s26_s28 = sshll.u32 %s618_s27, 4  ;;  %p525_p0 = scmp.ne.s32.totalorder %s752_s2, %s524_s9  ;;  %s27_s28 = int_to_ptr.vmem [resolvable:$true] %s26_s28 }
   0x4   :  { %p528_p1 = scmp.lt.u32.totalorder %s524_s9, %s752_s2 }
   0x6   :  { %p530_p2 = pnand %p528_p1, %p525_p0 }
   0x8   :  { %533 = shalt.err (!%p530_p2)
}
   0x9   :  { %s534_s14 = scalar_lea.vmem %s27_s28, 4096  ;;  %p539_p4 = scmp.lt.s32.totalorder %s27_s28, %s27_s28 }
   0xa   :  { %p535_p3 = scmp.ne.s32.totalorder %s27_s28, %s534_s14  ;;  %p540_p5 = scmp.lt.s32.totalorder %s534_s14, %s534_s14 }
   0xc   :  { %p541_p6 = por %p540_p5, %p539_p4 }
   0xe   :  { %p542_p7 = pnand %p541_p6, %p535_p3 }
  0x10   :  { %545 = shalt.err (!%p542_p7)
}
  0x11   :  { %s619_s15 = smov 512   ;;  %s620_s16 = smov 32  }
  0x12   :  { %32 = dma.hbm_to_vmem [thread:$0]  %s752_s2, 4096, %s27_s28, [#allocation4], %s619_s15, %s619_s15, %s620_s16  }
  0x13   :  { %612 = dma.done.wait [#allocation4], 4096  }
  0x14   :  { %613 = vsyncadd [#allocation4], 4294963200  ;;  %v621_v0 = vmov 0.0   ;;  %v69_v1 = vld [vmem:[#allocation3 + $0x8] sm:$0xff]  ;;  %v68_v3 = vld [vmem:[#allocation3] sm:$0xff]  ;;  %vm122_vm0 = vcmask 523264   ;;  %v102_v57 = vlaneseq }
  0x15   :  { %190 = vmatprep.mubr.f32.mxu0 %v621_v0  ;;  %261 = vmatprep.mubr.f32.mxu1 %v621_v0  ;;  %v73_v2 = vld [vmem:[#allocation3 + $0x28] sm:$0xff]  ;;  %v72_v5 = vld [vmem:[#allocation3 + $0x20] sm:$0xff]  ;;  %v71_v19 = vld [vmem:[#allocation3 + $0x18] sm:$0xff]  ;;  %v622_v53 = vmov 0.0|0.0   ;;  %vm623_vm1 = vmmov 0   ;;  %vm293_vm2 = vcmask 261120  }
  0x16   :  { %v461_v4 = vpack.c.bf16 %v73_v2, %v69_v1  ;;  %v77_v6 = vld [vmem:[#allocation3 + $0x48] sm:$0xff]  ;;  %v463_v8 = vpack.c.bf16 %v72_v5, %v68_v3  ;;  %v76_v10 = vld [vmem:[#allocation3 + $0x40] sm:$0xff]  ;;  %v75_v20 = vld [vmem:[#allocation3 + $0x38] sm:$0xff]  ;;  %v103_v58 = vshrl.u32 %v102_v57, 7  ;;  %s624_s29 = smov [#allocation7]  }
  0x17   :  { %v81_v7 = vld [vmem:[#allocation3 + $0x68] sm:$0xff]  ;;  %v80_v11 = vld [vmem:[#allocation3 + $0x60] sm:$0xff]  ;;  %v477_v22 = vpack.c.bf16 %v75_v20, %v71_v19  ;;  %v70_v23 = vld [vmem:[#allocation3 + $0x10] sm:$0xff]  ;;  %s406_s30 = sshll.u32 %s624_s29, 4  ;;  %s407_s30 = int_to_ptr.vmem [resolvable:$true] %s406_s30 }
  0x18   :  { %v465_v9 = vpack.c.bf16 %v81_v7, %v77_v6  ;;  %v85_v12 = vld [vmem:[#allocation3 + $0x88] sm:$0xff]  ;;  %462 = vmatprep.subr.bf16.mxu0 %v461_v4  ;;  %v467_v14 = vpack.c.bf16 %v80_v11, %v76_v10  ;;  %v84_v15 = vld [vmem:[#allocation3 + $0x80] sm:$0xff]  ;;  %v74_v24 = vld [vmem:[#allocation3 + $0x30] sm:$0xff]  ;;  %v104_v59 = vsub.s32 0, %v103_v58  ;;  %v108_v61 = vsub.s32 1, %v103_v58  ;;  %p551_p9 = scmp.lt.s32.totalorder %s407_s30, %s407_s30 }
  0x19   :  { %v89_v13 = vld [vmem:[#allocation3 + $0xa8] sm:$0xff]  ;;  %464 = vmatpush1.bf16.msra.mxu0 %v463_v8  ;;  %v88_v16 = vld [vmem:[#allocation3 + $0xa0] sm:$0xff]  ;;  %v479_v25 = vpack.c.bf16 %v74_v24, %v70_v23  ;;  %v79_v26 = vld [vmem:[#allocation3 + $0x58] sm:$0xff]  ;;  %478 = vmatprep.subr.bf16.mxu1 %v477_v22  ;;  %v116_v1 = vsub.s32 3, %v103_v58  ;;  %v112_v8 = vsub.s32 2, %v103_v58 }
  0x1a   :  { %466 = vmatprep.subr.bf16.mxu0 %v465_v9  ;;  %v469_v17 = vpack.c.bf16 %v89_v13, %v85_v12  ;;  %v93_v18 = vld [vmem:[#allocation3 + $0xc8] sm:$0xff]  ;;  %v83_v27 = vld [vmem:[#allocation3 + $0x78] sm:$0xff]  ;;  %v78_v28 = vld [vmem:[#allocation3 + $0x50] sm:$0xff]  ;;  %v471_v29 = vpack.c.bf16 %v88_v16, %v84_v15 }
  0x1b   :  { %v97_v21 = vld [vmem:[#allocation3 + $0xe8] sm:$0xff]  ;;  %v481_v30 = vpack.c.bf16 %v83_v27, %v79_v26  ;;  %v82_v31 = vld [vmem:[#allocation3 + $0x70] sm:$0xff]  ;;  %v87_v32 = vld [vmem:[#allocation3 + $0x98] sm:$0xff]  ;;  %480 = vmatpush1.bf16.msra.mxu1 %v479_v25 }
  0x1c   :  { %v91_v33 = vld [vmem:[#allocation3 + $0xb8] sm:$0xff]  ;;  %v473_v34 = vpack.c.bf16 %v97_v21, %v93_v18  ;;  %v92_v35 = vld [vmem:[#allocation3 + $0xc0] sm:$0xff]  ;;  %v483_v37 = vpack.c.bf16 %v82_v31, %v78_v28  ;;  %v86_v39 = vld [vmem:[#allocation3 + $0x90] sm:$0xff] }
  0x1d   :  { %468 = vmatpush1.bf16.msra.mxu0 %v467_v14  ;;  %v96_v36 = vld [vmem:[#allocation3 + $0xe0] sm:$0xff]  ;;  %482 = vmatprep.subr.bf16.mxu1 %v481_v30  ;;  %v485_v38 = vpack.c.bf16 %v91_v33, %v87_v32  ;;  %v90_v40 = vld [vmem:[#allocation3 + $0xb0] sm:$0xff]  ;;  %v95_v41 = vld [vmem:[#allocation3 + $0xd8] sm:$0xff] }
  0x1e   :  { %470 = vmatprep.subr.bf16.mxu0 %v469_v17  ;;  %v99_v42 = vld [vmem:[#allocation3 + $0xf8] sm:$0xff]  ;;  %v475_v43 = vpack.c.bf16 %v96_v36, %v92_v35  ;;  %v487_v44 = vpack.c.bf16 %v90_v40, %v86_v39  ;;  %v94_v46 = vld [vmem:[#allocation3 + $0xd0] sm:$0xff]  ;;  %v300_v51 = vld [vmem:[%s755_s5 + $0x8] sm:$0xff] }
  0x1f   :  { %484 = vmatpush1.bf16.msra.mxu1 %v483_v37  ;;  %v489_v45 = vpack.c.bf16 %v99_v42, %v95_v41  ;;  %v98_v47 = vld [vmem:[#allocation3 + $0xf0] sm:$0xff]  ;;  %v67_v48 = vld [vmem:[%s750_s0] sm:$0xff]  ;;  %v301_v52 = vld [vmem:[%s755_s5 + $0x10] sm:$0xff] }
  0x20   :  { %486 = vmatprep.subr.bf16.mxu1 %v485_v38  ;;  %v491_v49 = vpack.c.bf16 %v98_v47, %v94_v46  ;;  %v299_v50 = vld [vmem:[%s755_s5] sm:$0xff]  ;;  %v302_v55 = vld [vmem:[%s755_s5 + $0x18] sm:$0xff] }
  0x21   :  { %472 = vmatpush1.bf16.msra.mxu0 %v471_v29  ;;  %v494_v54 = vpack.c.bf16 %v300_v51, %v299_v50  ;;  %v497_v56 = vpack.c.bf16 %v302_v55, %v301_v52  ;;  %v100_v60 = vld [vmem:[%s753_s3] sm:$0xf] }
  0x22   :  { %474 = vmatprep.subr.bf16.mxu0 %v473_v34  ;;  %v105_v62 = vrot.slane %v100_v60, %v104_v59  ;;  %v109_v63 = vrot.slane %v100_v60, %v108_v61  ;;  %v117_v6 = vrot.slane %v100_v60, %v116_v1  ;;  %v113_v12 = vrot.slane %v100_v60, %v112_v8  ;;  %v287_v21 = vld [vmem:[%s751_s1] sm:$0xff]  ;;  %s546_s1 = scalar_lea.vmem %s407_s30, 128 }
  0x23   :  { %488 = vmatpush1.bf16.msra.mxu1 %v487_v44  ;;  %p547_p8 = scmp.ne.s32.totalorder %s407_s30, %s546_s1  ;;  %p552_p10 = scmp.lt.s32.totalorder %s546_s1, %s546_s1 }
  0x24   :  { %490 = vmatprep.subr.bf16.mxu1 %v489_v45 }
  0x25   :  { %476 = vmatpush1.bf16.msra.mxu0 %v475_v43  ;;  %p553_p11 = por %p552_p10, %p551_p9 }
  0x26   :  { %493 = vmatprep.subr.bf16.mxu0 %v622_v53 }
  0x27   :  { %492 = vmatpush1.bf16.msra.mxu1 %v491_v49  ;;  %p554_p12 = pnand %p553_p11, %p547_p8 }
  0x28   :  { %438 = vmatmul.mubr.msk.f32.vlgmr.msra.gmra.mrb[0].mxu0 %vm122_vm0, %v67_v48 }
  0x29   :  { %458 = vmatprep.mubr.msk.f32.mxu0 %vm623_vm1, %v621_v0  ;;  %495 = vmatpush3.bf16.msra.mxu0 %v494_v54 }
  0x2a   :  { %439 = vmatmul.mubr.msk.f32.vlgmr.msra.gmra.mrb[0].mxu1 %vm122_vm0, %v67_v48  ;;  %496 = vmatprep.subr.bf16.mxu0 %v622_v53 }
  0x2d   :  { %498 = vmatpush3.bf16.msra.mxu0 %v497_v56 }
  0xfb   :  { %v192_v2 = vpop.f32.mrb[0].mxu0 }
  0xfc   :  { %v193_v3 = vadd.f32 %v192_v2, %v105_v62  ;;  %v194_v4 = vpop.f32.mrb[1].mxu0 }
  0xfd   :  { %v195_v5 = vadd.f32 %v194_v4, %v109_v63  ;;  %v263_v9 = vpop.f32.mrb[0].mxu1 }
  0xfe   :  { %v440_v0 = vmul.f32 -1.442695, %v193_v3  ;;  %v265_v10 = vpop.f32.mrb[1].mxu1  ;;  %v264_v14 = vadd.f32 %v263_v9, %v113_v12 }
  0xff   :  { %v441_v7 = vmul.f32 -1.442695, %v195_v5  ;;  %v266_v11 = vadd.f32 %v265_v10, %v117_v6 }
 0x100   :  { %508 = vpow2.f32 %v440_v0 }
 0x101   :  { %510 = vpow2.f32 %v441_v7  ;;  %v442_v13 = vmul.f32 -1.442695, %v266_v11 }
 0x103   :  { %512 = vpow2.f32 %v442_v13 }
 0x104   :  { %514 = vtanh.f32 %v264_v14 }
 0x10a   :  { %v509_v15 = vpop.eup %508 }
 0x10b   :  { %v511_v16 = vpop.eup %510  ;;  %v271_v17 = vadd.f32 1.0, %v509_v15 }
 0x10c   :  { %v277_v18 = vadd.f32 1.0, %v511_v16 }
 0x10d   :  { %516 = vrcp.f32 %v271_v17  ;;  %v513_v19 = vpop.eup %512 }
 0x10e   :  { %518 = vrcp.f32 %v277_v18  ;;  %v515_v20 = vpop.eup %514  ;;  %v284_v23 = vadd.f32 1.0, %v513_v19 }
 0x110   :  { %520 = vrcp.f32 %v284_v23 }
 0x117   :  { %v517_v22 = vpop.eup %516 }
 0x118   :  { %v519_v24 = vpop.eup %518  ;;  %v289_v25 = vmul.f32 %v517_v22, %v515_v20 }
 0x119   :  { %v288_v26 = vmul.f32 %v519_v24, %v287_v21 }
 0x11a   :  { %v521_v28 = vpop.eup %520 }
 0x11b   :  { %v290_v27 = vadd.f32 %v289_v25, %v288_v26 }
 0x11d   :  { %522 = vtanh.f32 %v290_v27  ;;  %296 = vst.msk [vmem:[#allocation9] sm:$0xff] %vm293_vm2, %v290_v27 }
 0x127   :  { %v523_v29 = vpop.eup %522 }
 0x128   :  { %v292_v30 = vmul.f32 %v523_v29, %v521_v28 }
 0x12a   :  { %294 = vst.msk [vmem:[#allocation2] sm:$0xff] %vm293_vm2, %v292_v30  ;;  %295 = vst.msk [vmem:[#allocation7] sm:$0xff] %vm293_vm2, %v292_v30 }
 0x131   :  { %v298_v31 = vld [vmem:[#allocation2] sm:$0xff] }
 0x132   :  { %459 = vmatmul.mubr.msk.f32.vlgmr.msra.gmra.mrb[2].mxu0 %vm293_vm2, %v298_v31 }
 0x133   :  { %557 = shalt.err (!%p554_p12)
}
 0x134   :  { %s558_s11 = scalar_lea.hbm %s757_s7, 128 }
 0x135   :  { %p559_p13 = scmp.ne.s32.totalorder %s757_s7, %s558_s11  ;;  %p562_p0 = scmp.lt.u32.totalorder %s558_s11, %s757_s7 }
 0x137   :  { %p564_p1 = pnand %p562_p0, %p559_p13 }
 0x139   :  { %567 = shalt.err (!%p564_p1)
}
 0x13a   :  { %409 = dma.vmem_to_hbm [thread:$0]  %s407_s30, 128, %s757_s7, [#allocation8]  }
 0x13b   :  { %s625_s18 = smov [#allocation9]  }
 0x13c   :  { %s416_s2 = sshll.u32 %s625_s18, 4  ;;  %s417_s2 = int_to_ptr.vmem [resolvable:$true] %s416_s2 }
 0x13d   :  { %s568_s19 = scalar_lea.vmem %s417_s2, 128  ;;  %p573_p3 = scmp.lt.s32.totalorder %s417_s2, %s417_s2 }
 0x13e   :  { %p569_p2 = scmp.ne.s32.totalorder %s417_s2, %s568_s19  ;;  %p574_p4 = scmp.lt.s32.totalorder %s568_s19, %s568_s19 }
 0x140   :  { %p575_p5 = por %p574_p4, %p573_p3 }
 0x142   :  { %p576_p6 = pnand %p575_p5, %p569_p2 }
 0x144   :  { %579 = shalt.err (!%p576_p6)
}
 0x145   :  { %s580_s22 = scalar_lea.hbm %s758_s8, 128 }
 0x146   :  { %p581_p7 = scmp.ne.s32.totalorder %s758_s8, %s580_s22  ;;  %p584_p8 = scmp.lt.u32.totalorder %s580_s22, %s758_s8 }
 0x148   :  { %p586_p9 = pnand %p584_p8, %p581_p7 }
 0x14a   :  { %589 = shalt.err (!%p586_p9)
}
 0x14b   :  { %419 = dma.vmem_to_hbm [thread:$0]  %s417_s2, 128, %s758_s8, [#allocation8]   ;;  %v443_v32 = vld [vmem:[%s754_s4] ss:$0 sm:$0xff] }
 0x14c   :  { %s626_s3 = smov [#allocation6]  }
 0x14d   :  { %s396_s5 = sshll.u32 %s626_s3, 4  ;;  %s397_s5 = int_to_ptr.vmem [resolvable:$true] %s396_s5 }
 0x14e   :  { %s590_s29 = scalar_lea.vmem %s397_s5, 128  ;;  %p595_p11 = scmp.lt.s32.totalorder %s397_s5, %s397_s5 }
 0x14f   :  { %p591_p10 = scmp.ne.s32.totalorder %s397_s5, %s590_s29  ;;  %p596_p12 = scmp.lt.s32.totalorder %s590_s29, %s590_s29 }
 0x151   :  { %p597_p13 = por %p596_p12, %p595_p11 }
 0x153   :  { %p598_p0 = pnand %p597_p13, %p591_p10 }
 0x205   :  { %v381_v33 = vpop.f32.mrb[2].mxu0 }
 0x206   :  { %v382_v34 = vadd.f32 %v443_v32, %v381_v33  ;;  %v460_v35 = vpop.f32.mrb[3].mxu0 }
 0x208   :  { %386 = vst.msk [vmem:[#allocation6] sm:$0xff] %vm122_vm0, %v382_v34 }
 0x209   :  { %601 = shalt.err (!%p598_p0)
}
 0x20a   :  { %s602_s1 = scalar_lea.hbm %s756_s6, 128 }
 0x20b   :  { %p603_p1 = scmp.ne.s32.totalorder %s756_s6, %s602_s1  ;;  %p606_p2 = scmp.lt.u32.totalorder %s602_s1, %s756_s6 }
 0x20d   :  { %p608_p3 = pnand %p606_p2, %p603_p1 }
 0x20f   :  { %611 = shalt.err (!%p608_p3)
}
 0x210   :  { %399 = dma.vmem_to_hbm [thread:$0]  %s397_s5, 128, %s756_s6, [#allocation5]  }
 0x211   :  { %614 = dma.done.wait [#allocation5], 128  }
 0x212   :  { %615 = vsyncadd [#allocation5], 4294967168 }
 0x213   :  { %616 = dma.done.wait [#allocation8], 256  }
 0x214   :  { %617 = vsyncadd [#allocation8], 4294967040 }
 0x215   :  { %429 = vsyncpa [#allocation4], 1 }
 0x216   :  { %430 = vsyncpa [#allocation5], 1 }
 0x217   :  { %431 = vsyncpa [#allocation8], 1 }

</bundles_post_ra>
